<compile_context>
chip_gen: v6e
topology: v6e:2x2x1
jax: 0.10.0
libtpu: 0.0.40
codegen_flags: <defaults>
</compile_context>

<pallas_src>
import jax
import jax.numpy as jnp
from jax.experimental import pallas as pl
from jax.experimental.pallas import tpu as pltpu

EPS = 1e-8


def _make_resblock_kernel(*, downsample, b_tile, length, l_out, out_dims,
                          compute_dtype):
    """Builds the fused ResBlock kernel for one (b_tile*length, C) tile."""
    inv3 = 1.0 / 3.0
    n_per_sample = float(out_dims * length)   # GroupNorm(1) reduces over C * L

    def kernel(*refs):
        if downsample:
            (x_ref, w1_ref, w2_ref, wd_ref, g1_ref, b1_ref, g2_ref, b2_ref,
             a1_ref, a2_ref, seg_ref, segt_ref, o_ref, h_scr) = refs
        else:
            (x_ref, w1_ref, w2_ref, g1_ref, b1_ref, g2_ref, b2_ref,
             a1_ref, a2_ref, seg_ref, segt_ref, o_ref, h_scr) = refs

        x = x_ref[...]                               # (b_tile*L, C_in), f32
        x_mm = x.astype(compute_dtype)
        seg = seg_ref[...]                           # (b_tile*L, b_tile)
        segt = segt_ref[...]                         # (b_tile, b_tile*L)

        def group_norm(h, gamma, beta):
            # One-pass per-sample stats: sum and sum-of-squares via tiny
            # segment matmuls; var = E[h^2] - mean^2 (no second full pass).
            ssum = jnp.dot(segt, h, preferred_element_type=jnp.float32)
            ssq = jnp.dot(segt, h * h, preferred_element_type=jnp.float32)
            mean = jnp.sum(ssum, axis=1, keepdims=True) / n_per_sample  # (b_tile,1)
            ex2 = jnp.sum(ssq, axis=1, keepdims=True) / n_per_sample
            rstd = jax.lax.rsqrt(ex2 - mean * mean + EPS)
            # Broadcast per-sample scalars back to rows (rows are b-major).
            row_mean = jnp.dot(seg, mean, preferred_element_type=jnp.float32)
            row_rstd = jnp.dot(seg, rstd, preferred_element_type=jnp.float32)
            return (h - row_mean) * row_rstd * gamma + beta

        # conv1 (1x1): one big channels-last matmul on the MXU.
        h = jnp.dot(x_mm, w1_ref[...], preferred_element_type=jnp.float32)
        h = group_norm(h, g1_ref[...], b1_ref[...])
        h = jnp.where(h >= 0, h, h * a1_ref[0])           # PReLU1 (SMEM scalar)

        # conv2 (1x1)
        h = jnp.dot(h.astype(compute_dtype), w2_ref[...],
                    preferred_element_type=jnp.float32)
        h = group_norm(h, g2_ref[...], b2_ref[...])

        # residual: identity skip (no matmul) when in_dims == out_dims.
        if downsample:
            h = h + jnp.dot(x_mm, wd_ref[...], preferred_element_type=jnp.float32)
        else:
            h = h + x
        h = jnp.where(h >= 0, h, h * a2_ref[0])           # PReLU2 (SMEM scalar)

        # AvgPool1d(kernel=3, stride=3): 3-tap strided add along the sublane
        # (row) axis from VMEM scratch -- no O(L^2) pooling matrix.
        h_scr[...] = h
        if length % 3 == 0:
            rows_out = b_tile * l_out
            pooled = (h_scr[pl.ds(0, rows_out, stride=3), :] +
                      h_scr[pl.ds(1, rows_out, stride=3), :] +
                      h_scr[pl.ds(2, rows_out, stride=3), :]) * inv3
            o_ref[...] = pooled.astype(o_ref.dtype)
        else:
            # General L: per-sample taps (tail elements dropped, as in PyTorch).
            for b in range(b_tile):
                base = b * length
                pooled = (h_scr[pl.ds(base + 0, l_out, stride=3), :] +
                          h_scr[pl.ds(base + 1, l_out, stride=3), :] +
                          h_scr[pl.ds(base + 2, l_out, stride=3), :]) * inv3
                o_ref[pl.ds(b * l_out, l_out), :] = pooled.astype(o_ref.dtype)

    return kernel


def resblock_forward(x, params, *, b_tile=8, compute_dtype=jnp.float32,
                     vmem_limit_bytes=48 * 1024 * 1024):
    """x: (B, C_in, L) float32. Returns (B, C_out, L // 3) float32."""
    B, C_in, L = x.shape
    w1, w2 = params["w1"], params["w2"]
    C_out = w1.shape[0]
    downsample = "wd" in params
    if not downsample:
        assert C_in == C_out, "identity skip requires in_dims == out_dims"
    assert L >= 3, "AvgPool1d(3) needs L >= 3"
    L_out = L // 3

    b_tile = max(1, min(b_tile, B))
    n_tiles = pl.cdiv(B, b_tile)
    B_pad = n_tiles * b_tile

    # Channels-last, batch-folded layout: (B_pad*L, C_in); channels on lanes.
    x_cl = jnp.transpose(x, (0, 2, 1))                       # (B, L, C_in)
    if B_pad != B:
        x_cl = jnp.pad(x_cl, ((0, B_pad - B), (0, 0), (0, 0)))
    x2d = x_cl.reshape(B_pad * L, C_in)

    w1t = jnp.transpose(w1).astype(compute_dtype)            # (C_in, C_out)
    w2t = jnp.transpose(w2).astype(compute_dtype)            # (C_out, C_out)

    g1 = params["g1"].reshape(1, C_out).astype(jnp.float32)  # lane-major affine
    b1 = params["b1"].reshape(1, C_out).astype(jnp.float32)
    g2 = params["g2"].reshape(1, C_out).astype(jnp.float32)
    b2 = params["b2"].reshape(1, C_out).astype(jnp.float32)
    a1 = params["a1"].reshape(1).astype(jnp.float32)          # SMEM scalars
    a2 = params["a2"].reshape(1).astype(jnp.float32)

    # Tiny grid-invariant segment matrices (row -> sample-within-tile one-hots)
    # used for the per-sample GroupNorm stats + broadcast-back on the MXU.
    rows = b_tile * L
    row_sample = jnp.arange(rows, dtype=jnp.int32) // L
    seg = (row_sample[:, None] ==
           jnp.arange(b_tile, dtype=jnp.int32)[None, :]).astype(jnp.float32)
    segt = seg.T

    rows_out = b_tile * L_out
    const = lambda i: (0, 0)

    in_specs = [pl.BlockSpec((rows, C_in), lambda i: (i, 0))]
    operands = [x2d]
    in_specs += [pl.BlockSpec((C_in, C_out), const),
                 pl.BlockSpec((C_out, C_out), const)]
    operands += [w1t, w2t]
    if downsample:
        wdt = jnp.transpose(params["wd"]).astype(compute_dtype)
        in_specs.append(pl.BlockSpec((C_in, C_out), const))
        operands.append(wdt)
    in_specs += [pl.BlockSpec((1, C_out), const)] * 4
    operands += [g1, b1, g2, b2]
    in_specs += [pl.BlockSpec(memory_space=pltpu.MemorySpace.SMEM)] * 2
    operands += [a1, a2]
    in_specs += [pl.BlockSpec((rows, b_tile), const),
                 pl.BlockSpec((b_tile, rows), const)]
    operands += [seg, segt]

    kernel = _make_resblock_kernel(
        downsample=downsample, b_tile=b_tile, length=L, l_out=L_out,
        out_dims=C_out, compute_dtype=compute_dtype)

    grid_spec = pltpu.PrefetchScalarGridSpec(
        num_scalar_prefetch=0,
        grid=(n_tiles,),
        in_specs=in_specs,
        out_specs=pl.BlockSpec((rows_out, C_out), lambda i: (i, 0)),
        scratch_shapes=[pltpu.VMEM((rows, C_out), jnp.float32)],
    )

    out2d = pl.pallas_call(
        kernel,
        out_shape=jax.ShapeDtypeStruct((B_pad * L_out, C_out), jnp.float32),
        grid_spec=grid_spec,
        compiler_params=pltpu.CompilerParams(
            dimension_semantics=("parallel",),
            vmem_limit_bytes=vmem_limit_bytes),
    )(*operands)

    out = out2d.reshape(B_pad, L_out, C_out)[:B]
    return jnp.transpose(out, (0, 2, 1))                     # (B, C_out, L_out)


def make_params(key, in_dims, out_dims):
    k1, k2, k3 = jax.random.split(key, 3)
    s1 = 1.0 / (in_dims ** 0.5)
    s2 = 1.0 / (out_dims ** 0.5)
    p = {
        "w1": jax.random.uniform(k1, (out_dims, in_dims), jnp.float32, -s1, s1),
        "w2": jax.random.uniform(k2, (out_dims, out_dims), jnp.float32, -s2, s2),
        # GroupNorm affine (PyTorch default: weight=1, bias=0)
        "g1": jnp.ones((out_dims,), jnp.float32),
        "b1": jnp.zeros((out_dims,), jnp.float32),
        "g2": jnp.ones((out_dims,), jnp.float32),
        "b2": jnp.zeros((out_dims,), jnp.float32),
        # PReLU default init: single shared slope = 0.25
        "a1": jnp.array([0.25], jnp.float32),
        "a2": jnp.array([0.25], jnp.float32),
    }
    if in_dims != out_dims:   # downsample branch only when shapes differ
        p["wd"] = jax.random.uniform(k3, (out_dims, in_dims), jnp.float32, -s1, s1)
    return p


def resblock_reference(x, params):
    """Pure-JAX reference mirroring the PyTorch forward pass."""
    def gn(h, g, b):
        mean = jnp.mean(h, axis=(1, 2), keepdims=True)
        var = jnp.mean((h - mean) ** 2, axis=(1, 2), keepdims=True)
        return (h - mean) / jnp.sqrt(var + EPS) * g[None, :, None] + b[None, :, None]

    def prelu(h, a):
        return jnp.where(h >= 0, h, a * h)

    h = jnp.einsum("oi,bil->bol", params["w1"], x)
    h = prelu(gn(h, params["g1"], params["b1"]), params["a1"][0])
    h = jnp.einsum("oi,bil->bol", params["w2"], h)
    h = gn(h, params["g2"], params["b2"])
    residual = jnp.einsum("oi,bil->bol", params["wd"], x) if "wd" in params else x
    h = prelu(h + residual, params["a2"][0])
    B, C, L = h.shape
    L_out = L // 3
    return h[:, :, :L_out * 3].reshape(B, C, L_out, 3).mean(axis=-1)


if __name__ == "__main__":
    key = jax.random.PRNGKey(0)
    k_x1, k_p1, k_x2, k_p2 = jax.random.split(key, 4)

    # Variant 1: in_dims != out_dims -> downsample 1x1 conv on the residual.
    B, in_dims, out_dims, L = 2, 4, 8, 24
    x1 = jax.random.normal(k_x1, (B, in_dims, L), dtype=jnp.float32)
    p1 = make_params(k_p1, in_dims, out_dims)
    out1 = jax.block_until_ready(resblock_forward(x1, p1))
    ref1 = resblock_reference(x1, p1)
    assert out1.shape == (B, out_dims, L // 3), out1.shape
    assert jnp.allclose(out1, ref1, atol=2e-4, rtol=2e-4), \
        float(jnp.max(jnp.abs(out1 - ref1)))

    # Variant 2: in_dims == out_dims -> identity skip, no downsample matmul.
    x2 = jax.random.normal(k_x2, (B, out_dims, L), dtype=jnp.float32)
    p2 = make_params(k_p2, out_dims, out_dims)
    out2 = jax.block_until_ready(resblock_forward(x2, p2))
    ref2 = resblock_reference(x2, p2)
    assert out2.shape == (B, out_dims, L // 3), out2.shape
    assert jnp.allclose(out2, ref2, atol=2e-4, rtol=2e-4), \
        float(jnp.max(jnp.abs(out2 - ref2)))

    print("KERNEL_OK")
</pallas_src>

<mosaic_0001>
module attributes {stable_mosaic.version = 11 : i64} {
  func.func @kernel(%arg0: i32, %arg1: memref<48x4xf32, #tpu.memory_space<vmem>>, %arg2: memref<4x8xf32, #tpu.memory_space<vmem>>, %arg3: memref<8x8xf32, #tpu.memory_space<vmem>>, %arg4: memref<4x8xf32, #tpu.memory_space<vmem>>, %arg5: memref<1x8xf32, #tpu.memory_space<vmem>>, %arg6: memref<1x8xf32, #tpu.memory_space<vmem>>, %arg7: memref<1x8xf32, #tpu.memory_space<vmem>>, %arg8: memref<1x8xf32, #tpu.memory_space<vmem>>, %arg9: memref<1xf32, #tpu.memory_space<smem>>, %arg10: memref<1xf32, #tpu.memory_space<smem>>, %arg11: memref<48x2xf32, #tpu.memory_space<vmem>>, %arg12: memref<2x48xf32, #tpu.memory_space<vmem>>, %arg13: memref<16x8xf32, #tpu.memory_space<vmem>>, %arg14: memref<48x8xf32, #tpu.memory_space<vmem>>) attributes {dimension_semantics = [#tpu.dimension_semantics<parallel>], iteration_bounds = array<i64: 1>, scalar_prefetch = 0 : i64, scratch_operands = 1 : i64, tpu.core_type = #tpu.core_type<tc>, window_params = [{transform_indices = @transform_0, window_bounds = array<i64: 48, 4>}, {pipeline_mode = #tpu.pipeline_mode<synchronous>, transform_indices = @transform_1, window_bounds = array<i64: 4, 8>}, {pipeline_mode = #tpu.pipeline_mode<synchronous>, transform_indices = @transform_2, window_bounds = array<i64: 8, 8>}, {pipeline_mode = #tpu.pipeline_mode<synchronous>, transform_indices = @transform_3, window_bounds = array<i64: 4, 8>}, {pipeline_mode = #tpu.pipeline_mode<synchronous>, transform_indices = @transform_4, window_bounds = array<i64: 1, 8>}, {pipeline_mode = #tpu.pipeline_mode<synchronous>, transform_indices = @transform_5, window_bounds = array<i64: 1, 8>}, {pipeline_mode = #tpu.pipeline_mode<synchronous>, transform_indices = @transform_6, window_bounds = array<i64: 1, 8>}, {pipeline_mode = #tpu.pipeline_mode<synchronous>, transform_indices = @transform_7, window_bounds = array<i64: 1, 8>}, {transform_indices = @transform_8, window_bounds = array<i64: 1>}, {transform_indices = @transform_9, window_bounds = array<i64: 1>}, {pipeline_mode = #tpu.pipeline_mode<synchronous>, transform_indices = @transform_10, window_bounds = array<i64: 48, 2>}, {pipeline_mode = #tpu.pipeline_mode<synchronous>, transform_indices = @transform_11, window_bounds = array<i64: 2, 48>}, {transform_indices = @transform_12, window_bounds = array<i64: 16, 8>}]} {
    %c0 = arith.constant 0 : index
    %c0_0 = arith.constant 0 : index
    %0 = vector.load %arg1[%c0, %c0_0] : memref<48x4xf32, #tpu.memory_space<vmem>>, vector<48x4xf32>
    %c0_1 = arith.constant 0 : index
    %c0_2 = arith.constant 0 : index
    %1 = vector.load %arg11[%c0_1, %c0_2] : memref<48x2xf32, #tpu.memory_space<vmem>>, vector<48x2xf32>
    %c0_3 = arith.constant 0 : index
    %c0_4 = arith.constant 0 : index
    %2 = vector.load %arg12[%c0_3, %c0_4] : memref<2x48xf32, #tpu.memory_space<vmem>>, vector<2x48xf32>
    %c0_5 = arith.constant 0 : index
    %c0_6 = arith.constant 0 : index
    %3 = vector.load %arg2[%c0_5, %c0_6] : memref<4x8xf32, #tpu.memory_space<vmem>>, vector<4x8xf32>
    %cst = arith.constant dense<0.000000e+00> : vector<48x8xf32>
    %4 = tpu.matmul %0, %3, %cst {dimension_numbers = #tpu.dot_dimension_numbers<[1], [0], [0], [1], [0, 0, 1, 1], [], []>} : vector<48x4xf32>, vector<4x8xf32>, vector<48x8xf32> -> vector<48x8xf32>
    %c0_7 = arith.constant 0 : index
    %c0_8 = arith.constant 0 : index
    %5 = vector.load %arg5[%c0_7, %c0_8] : memref<1x8xf32, #tpu.memory_space<vmem>>, vector<1x8xf32>
    %c0_9 = arith.constant 0 : index
    %c0_10 = arith.constant 0 : index
    %6 = vector.load %arg6[%c0_9, %c0_10] : memref<1x8xf32, #tpu.memory_space<vmem>>, vector<1x8xf32>
    %cst_11 = arith.constant dense<0.000000e+00> : vector<2x8xf32>
    %7 = tpu.matmul %2, %4, %cst_11 {dimension_numbers = #tpu.dot_dimension_numbers<[1], [0], [0], [1], [0, 0, 1, 1], [], []>} : vector<2x48xf32>, vector<48x8xf32>, vector<2x8xf32> -> vector<2x8xf32>
    %8 = arith.mulf %4, %4 : vector<48x8xf32>
    %cst_12 = arith.constant dense<0.000000e+00> : vector<2x8xf32>
    %9 = tpu.matmul %2, %8, %cst_12 {dimension_numbers = #tpu.dot_dimension_numbers<[1], [0], [0], [1], [0, 0, 1, 1], [], []>} : vector<2x48xf32>, vector<48x8xf32>, vector<2x8xf32> -> vector<2x8xf32>
    %cst_13 = arith.constant dense<0.000000e+00> : vector<2xf32>
    %10 = vector.multi_reduction <add>, %7, %cst_13 [1] : vector<2x8xf32> to vector<2xf32>
    %11 = vector.shape_cast %10 : vector<2xf32> to vector<2x1xf32>
    %cst_14 = arith.constant 1.920000e+02 : f32
    %12 = vector.broadcast %cst_14 : f32 to vector<2x1xf32>
    %13 = arith.divf %11, %12 : vector<2x1xf32>
    %cst_15 = arith.constant dense<0.000000e+00> : vector<2xf32>
    %14 = vector.multi_reduction <add>, %9, %cst_15 [1] : vector<2x8xf32> to vector<2xf32>
    %15 = vector.shape_cast %14 : vector<2xf32> to vector<2x1xf32>
    %cst_16 = arith.constant 1.920000e+02 : f32
    %16 = vector.broadcast %cst_16 : f32 to vector<2x1xf32>
    %17 = arith.divf %15, %16 : vector<2x1xf32>
    %18 = arith.mulf %13, %13 : vector<2x1xf32>
    %19 = arith.subf %17, %18 : vector<2x1xf32>
    %cst_17 = arith.constant 9.99999993E-9 : f32
    %20 = vector.broadcast %cst_17 : f32 to vector<2x1xf32>
    %21 = arith.addf %19, %20 : vector<2x1xf32>
    %22 = math.rsqrt %21 : vector<2x1xf32>
    %cst_18 = arith.constant dense<0.000000e+00> : vector<48x1xf32>
    %23 = tpu.matmul %1, %13, %cst_18 {dimension_numbers = #tpu.dot_dimension_numbers<[1], [0], [0], [1], [0, 0, 1, 1], [], []>} : vector<48x2xf32>, vector<2x1xf32>, vector<48x1xf32> -> vector<48x1xf32>
    %cst_19 = arith.constant dense<0.000000e+00> : vector<48x1xf32>
    %24 = tpu.matmul %1, %22, %cst_19 {dimension_numbers = #tpu.dot_dimension_numbers<[1], [0], [0], [1], [0, 0, 1, 1], [], []>} : vector<48x2xf32>, vector<2x1xf32>, vector<48x1xf32> -> vector<48x1xf32>
    %25 = vector.broadcast %23 : vector<48x1xf32> to vector<48x8xf32>
    %26 = arith.subf %4, %25 : vector<48x8xf32>
    %27 = vector.broadcast %24 : vector<48x1xf32> to vector<48x8xf32>
    %28 = arith.mulf %26, %27 : vector<48x8xf32>
    %29 = vector.broadcast %5 : vector<1x8xf32> to vector<48x8xf32>
    %30 = arith.mulf %28, %29 : vector<48x8xf32>
    %31 = vector.broadcast %6 : vector<1x8xf32> to vector<48x8xf32>
    %32 = arith.addf %30, %31 : vector<48x8xf32>
    %cst_20 = arith.constant 0.000000e+00 : f32
    %33 = vector.broadcast %cst_20 : f32 to vector<48x8xf32>
    %34 = arith.cmpf oge, %32, %33 : vector<48x8xf32>
    %c0_21 = arith.constant 0 : index
    %35 = memref.load %arg9[%c0_21] : memref<1xf32, #tpu.memory_space<smem>>
    %36 = vector.broadcast %35 : f32 to vector<48x8xf32>
    %37 = arith.mulf %32, %36 : vector<48x8xf32>
    %38 = arith.select %34, %32, %37 : vector<48x8xi1>, vector<48x8xf32>
    %c0_22 = arith.constant 0 : index
    %c0_23 = arith.constant 0 : index
    %39 = vector.load %arg3[%c0_22, %c0_23] : memref<8x8xf32, #tpu.memory_space<vmem>>, vector<8x8xf32>
    %cst_24 = arith.constant dense<0.000000e+00> : vector<48x8xf32>
    %40 = tpu.matmul %38, %39, %cst_24 {dimension_numbers = #tpu.dot_dimension_numbers<[1], [0], [0], [1], [0, 0, 1, 1], [], []>} : vector<48x8xf32>, vector<8x8xf32>, vector<48x8xf32> -> vector<48x8xf32>
    %c0_25 = arith.constant 0 : index
    %c0_26 = arith.constant 0 : index
    %41 = vector.load %arg7[%c0_25, %c0_26] : memref<1x8xf32, #tpu.memory_space<vmem>>, vector<1x8xf32>
    %c0_27 = arith.constant 0 : index
    %c0_28 = arith.constant 0 : index
    %42 = vector.load %arg8[%c0_27, %c0_28] : memref<1x8xf32, #tpu.memory_space<vmem>>, vector<1x8xf32>
    %cst_29 = arith.constant dense<0.000000e+00> : vector<2x8xf32>
    %43 = tpu.matmul %2, %40, %cst_29 {dimension_numbers = #tpu.dot_dimension_numbers<[1], [0], [0], [1], [0, 0, 1, 1], [], []>} : vector<2x48xf32>, vector<48x8xf32>, vector<2x8xf32> -> vector<2x8xf32>
    %44 = arith.mulf %40, %40 : vector<48x8xf32>
    %cst_30 = arith.constant dense<0.000000e+00> : vector<2x8xf32>
    %45 = tpu.matmul %2, %44, %cst_30 {dimension_numbers = #tpu.dot_dimension_numbers<[1], [0], [0], [1], [0, 0, 1, 1], [], []>} : vector<2x48xf32>, vector<48x8xf32>, vector<2x8xf32> -> vector<2x8xf32>
    %cst_31 = arith.constant dense<0.000000e+00> : vector<2xf32>
    %46 = vector.multi_reduction <add>, %43, %cst_31 [1] : vector<2x8xf32> to vector<2xf32>
    %47 = vector.shape_cast %46 : vector<2xf32> to vector<2x1xf32>
    %cst_32 = arith.constant 1.920000e+02 : f32
    %48 = vector.broadcast %cst_32 : f32 to vector<2x1xf32>
    %49 = arith.divf %47, %48 : vector<2x1xf32>
    %cst_33 = arith.constant dense<0.000000e+00> : vector<2xf32>
    %50 = vector.multi_reduction <add>, %45, %cst_33 [1] : vector<2x8xf32> to vector<2xf32>
    %51 = vector.shape_cast %50 : vector<2xf32> to vector<2x1xf32>
    %cst_34 = arith.constant 1.920000e+02 : f32
    %52 = vector.broadcast %cst_34 : f32 to vector<2x1xf32>
    %53 = arith.divf %51, %52 : vector<2x1xf32>
    %54 = arith.mulf %49, %49 : vector<2x1xf32>
    %55 = arith.subf %53, %54 : vector<2x1xf32>
    %cst_35 = arith.constant 9.99999993E-9 : f32
    %56 = vector.broadcast %cst_35 : f32 to vector<2x1xf32>
    %57 = arith.addf %55, %56 : vector<2x1xf32>
    %58 = math.rsqrt %57 : vector<2x1xf32>
    %cst_36 = arith.constant dense<0.000000e+00> : vector<48x1xf32>
    %59 = tpu.matmul %1, %49, %cst_36 {dimension_numbers = #tpu.dot_dimension_numbers<[1], [0], [0], [1], [0, 0, 1, 1], [], []>} : vector<48x2xf32>, vector<2x1xf32>, vector<48x1xf32> -> vector<48x1xf32>
    %cst_37 = arith.constant dense<0.000000e+00> : vector<48x1xf32>
    %60 = tpu.matmul %1, %58, %cst_37 {dimension_numbers = #tpu.dot_dimension_numbers<[1], [0], [0], [1], [0, 0, 1, 1], [], []>} : vector<48x2xf32>, vector<2x1xf32>, vector<48x1xf32> -> vector<48x1xf32>
    %61 = vector.broadcast %59 : vector<48x1xf32> to vector<48x8xf32>
    %62 = arith.subf %40, %61 : vector<48x8xf32>
    %63 = vector.broadcast %60 : vector<48x1xf32> to vector<48x8xf32>
    %64 = arith.mulf %62, %63 : vector<48x8xf32>
    %65 = vector.broadcast %41 : vector<1x8xf32> to vector<48x8xf32>
    %66 = arith.mulf %64, %65 : vector<48x8xf32>
    %67 = vector.broadcast %42 : vector<1x8xf32> to vector<48x8xf32>
    %68 = arith.addf %66, %67 : vector<48x8xf32>
    %c0_38 = arith.constant 0 : index
    %c0_39 = arith.constant 0 : index
    %69 = vector.load %arg4[%c0_38, %c0_39] : memref<4x8xf32, #tpu.memory_space<vmem>>, vector<4x8xf32>
    %cst_40 = arith.constant dense<0.000000e+00> : vector<48x8xf32>
    %70 = tpu.matmul %0, %69, %cst_40 {dimension_numbers = #tpu.dot_dimension_numbers<[1], [0], [0], [1], [0, 0, 1, 1], [], []>} : vector<48x4xf32>, vector<4x8xf32>, vector<48x8xf32> -> vector<48x8xf32>
    %71 = arith.addf %68, %70 : vector<48x8xf32>
    %cst_41 = arith.constant 0.000000e+00 : f32
    %72 = vector.broadcast %cst_41 : f32 to vector<48x8xf32>
    %73 = arith.cmpf oge, %71, %72 : vector<48x8xf32>
    %c0_42 = arith.constant 0 : index
    %74 = memref.load %arg10[%c0_42] : memref<1xf32, #tpu.memory_space<smem>>
    %75 = vector.broadcast %74 : f32 to vector<48x8xf32>
    %76 = arith.mulf %71, %75 : vector<48x8xf32>
    %77 = arith.select %73, %71, %76 : vector<48x8xi1>, vector<48x8xf32>
    %c0_43 = arith.constant 0 : index
    %c0_44 = arith.constant 0 : index
    %78 = vector.load %arg14[%c0_43, %c0_44] : memref<48x8xf32, #tpu.memory_space<vmem>>, vector<48x8xf32>
    tpu.vector_store %arg14[%c0_43, %c0_44], %77 {strides = array<i32>} : memref<48x8xf32, #tpu.memory_space<vmem>>, vector<48x8xf32>,
    %c0_45 = arith.constant 0 : index
    %c0_46 = arith.constant 0 : index
    %79 = tpu.strided_load %arg14[%c0_45, %c0_46] {strides = array<i32: 3, 1>} : memref<48x8xf32, #tpu.memory_space<vmem>>, vector<16x8xf32>
    %c1 = arith.constant 1 : index
    %c0_47 = arith.constant 0 : index
    %80 = tpu.strided_load %arg14[%c1, %c0_47] {strides = array<i32: 3, 1>} : memref<48x8xf32, #tpu.memory_space<vmem>>, vector<16x8xf32>
    %81 = arith.addf %79, %80 : vector<16x8xf32>
    %c2 = arith.constant 2 : index
    %c0_48 = arith.constant 0 : index
    %82 = tpu.strided_load %arg14[%c2, %c0_48] {strides = array<i32: 3, 1>} : memref<48x8xf32, #tpu.memory_space<vmem>>, vector<16x8xf32>
    %83 = arith.addf %81, %82 : vector<16x8xf32>
    %cst_49 = arith.constant 0.333333343 : f32
    %84 = vector.broadcast %cst_49 : f32 to vector<16x8xf32>
    %85 = arith.mulf %83, %84 : vector<16x8xf32>
    %c0_50 = arith.constant 0 : index
    %c0_51 = arith.constant 0 : index
    %86 = vector.load %arg13[%c0_50, %c0_51] : memref<16x8xf32, #tpu.memory_space<vmem>>, vector<16x8xf32>
    tpu.vector_store %arg13[%c0_50, %c0_51], %85 {strides = array<i32>} : memref<16x8xf32, #tpu.memory_space<vmem>>, vector<16x8xf32>,
    return
  }
  func.func @transform_0(%arg0: i32) -> (i32, i32) {
    %c0_i32 = arith.constant 0 : i32
    %c0_i32_0 = arith.constant 0 : i32
    return %arg0, %c0_i32 : i32, i32
  }
  func.func @transform_1(%arg0: i32) -> (i32, i32) {
    %c0_i32 = arith.constant 0 : i32
    %c0_i32_0 = arith.constant 0 : i32
    %c0_i32_1 = arith.constant 0 : i32
    return %c0_i32, %c0_i32_0 : i32, i32
  }
  func.func @transform_2(%arg0: i32) -> (i32, i32) {
    %c0_i32 = arith.constant 0 : i32
    %c0_i32_0 = arith.constant 0 : i32
    %c0_i32_1 = arith.constant 0 : i32
    return %c0_i32, %c0_i32_0 : i32, i32
  }
  func.func @transform_3(%arg0: i32) -> (i32, i32) {
    %c0_i32 = arith.constant 0 : i32
    %c0_i32_0 = arith.constant 0 : i32
    %c0_i32_1 = arith.constant 0 : i32
    return %c0_i32, %c0_i32_0 : i32, i32
  }
  func.func @transform_4(%arg0: i32) -> (i32, i32) {
    %c0_i32 = arith.constant 0 : i32
    %c0_i32_0 = arith.constant 0 : i32
    %c0_i32_1 = arith.constant 0 : i32
    return %c0_i32, %c0_i32_0 : i32, i32
  }
  func.func @transform_5(%arg0: i32) -> (i32, i32) {
    %c0_i32 = arith.constant 0 : i32
    %c0_i32_0 = arith.constant 0 : i32
    %c0_i32_1 = arith.constant 0 : i32
    return %c0_i32, %c0_i32_0 : i32, i32
  }
  func.func @transform_6(%arg0: i32) -> (i32, i32) {
    %c0_i32 = arith.constant 0 : i32
    %c0_i32_0 = arith.constant 0 : i32
    %c0_i32_1 = arith.constant 0 : i32
    return %c0_i32, %c0_i32_0 : i32, i32
  }
  func.func @transform_7(%arg0: i32) -> (i32, i32) {
    %c0_i32 = arith.constant 0 : i32
    %c0_i32_0 = arith.constant 0 : i32
    %c0_i32_1 = arith.constant 0 : i32
    return %c0_i32, %c0_i32_0 : i32, i32
  }
  func.func @transform_8(%arg0: i32) -> i32 {
    %c0_i32 = arith.constant 0 : i32
    %c0_i32_0 = arith.constant 0 : i32
    return %c0_i32 : i32
  }
  func.func @transform_9(%arg0: i32) -> i32 {
    %c0_i32 = arith.constant 0 : i32
    %c0_i32_0 = arith.constant 0 : i32
    return %c0_i32 : i32
  }
  func.func @transform_10(%arg0: i32) -> (i32, i32) {
    %c0_i32 = arith.constant 0 : i32
    %c0_i32_0 = arith.constant 0 : i32
    %c0_i32_1 = arith.constant 0 : i32
    return %c0_i32, %c0_i32_0 : i32, i32
  }
  func.func @transform_11(%arg0: i32) -> (i32, i32) {
    %c0_i32 = arith.constant 0 : i32
    %c0_i32_0 = arith.constant 0 : i32
    %c0_i32_1 = arith.constant 0 : i32
    return %c0_i32, %c0_i32_0 : i32, i32
  }
  func.func @transform_12(%arg0: i32) -> (i32, i32) {
    %c0_i32 = arith.constant 0 : i32
    %c0_i32_0 = arith.constant 0 : i32
    return %arg0, %c0_i32 : i32, i32
  }
}

</mosaic_0001>

<bundles_post_ra>
// kernel: tpu_custom_call.1
= control target key start
LH: loop header
LB: loop body
LE: loop exit
PB: predicated region body
PF: predicated region fallthrough
CT: control target
= control target key end

     0   :  { %vm76_vm0 = vcmask 1043456   ;;  %vm57_vm1 = vcmask 31744   ;;  %v1673_v7 = vmov 0.0   ;;  %vm1674_vm2 = vmmov 0   ;;  %s2053_s1 = inlined_call_operand.vmem [shape: f32[4,8], index: 1, kind: input, shape index: {}]   ;;  %s2054_s0 = inlined_call_operand.vmem [shape: f32[48,4], index: 0, kind: input, shape index: {}]   ;;  %s2055_s11 = inlined_call_operand.vmem [shape: f32[2,48], index: 11, kind: input, shape index: {}]   ;;  %s2056_s10 = inlined_call_operand.vmem [shape: f32[48,2], index: 10, kind: input, shape index: {}]   ;;  %s2057_s2 = inlined_call_operand.vmem [shape: f32[8,8], index: 2, kind: input, shape index: {}]   ;;  %s2058_s4 = inlined_call_operand.vmem [shape: f32[1,8], index: 4, kind: input, shape index: {}]   ;;  %s2059_s5 = inlined_call_operand.vmem [shape: f32[1,8], index: 5, kind: input, shape index: {}]   ;;  %s2060_s8 = inlined_call_operand.<no memory space> [shape: f32[1], index: 8, kind: input, shape index: {}]   ;;  %s2061_s3 = inlined_call_operand.vmem [shape: f32[4,8], index: 3, kind: input, shape index: {}]   ;;  %s2062_s6 = inlined_call_operand.vmem [shape: f32[1,8], index: 6, kind: input, shape index: {}]   ;;  %s2063_s7 = inlined_call_operand.vmem [shape: f32[1,8], index: 7, kind: input, shape index: {}]   ;;  %s2064_s9 = inlined_call_operand.<no memory space> [shape: f32[1], index: 9, kind: input, shape index: {}]   ;;  %s2065_s12 = inlined_call_operand.vmem [shape: f32[16,8], index: 12, kind: output, shape index: {}]  }
   0x1   :  { %v56_v0 = vld [vmem:[%s2053_s1] sm:$0xf]  ;;  %v1752_v2 = vld [vmem:[%s2054_s0 + $0x8] sm:$0xff]  ;;  %v1760_v3 = vld [vmem:[%s2054_s0 + $0x10] sm:$0xff]  ;;  %1538 = vmatprep.subr.mxu1 %v1673_v7  ;;  %1550 = vmatprep.mubr.msk.f32.mxu1 %vm1674_vm2, %v1673_v7  ;;  %vm177_vm3 = vcmask 392192   ;;  %vm327_vm4 = vcmask 58368  }
   0x2   :  { %v1747_v1 = vld [vmem:[%s2054_s0] sm:$0xff]  ;;  %1527 = vmatprep.subr.msk.mxu0 %vm76_vm0, %v56_v0  ;;  %v1770_v4 = vld [vmem:[%s2054_s0 + $0x18] sm:$0xff]  ;;  %v1784_v6 = vld [vmem:[%s2054_s0 + $0x28] sm:$0xff]  ;;  %vm341_vm5 = vcmask 15360   ;;  %v1675_v28 = vmov 0   ;;  %vm360_vm6 = vcmask 1041408  }
   0x3   :  { %1529 = vmatprep.mubr.msk.f32.mxu0 %vm57_vm1, %v1747_v1  ;;  %1528 = vmatpush3.msk.msra.mxu0 %vm76_vm0, %v56_v0  ;;  %v1775_v5 = vld [vmem:[%s2054_s0 + $0x20] sm:$0xff]  ;;  %v1857_v31 = vld [vmem:[%s2056_s10 + $0x8] sm:$0xff]  ;;  %v1863_v32 = vld [vmem:[%s2056_s10 + $0x10] sm:$0xff]  ;;  %vm674_vm9 = vcmask 64512  }
   0x4   :  { %1530 = vmatmul.mubr.msk.f32.vlgmr.msra.gmra.mxu0 %vm57_vm1, %v1752_v2  ;;  %1553 = vmatprep.subr.mxu0 %v1673_v7  ;;  %v1831_v19 = vld [vmem:[%s2055_s11] sm:$0x3]  ;;  %v1873_v36 = vld [vmem:[%s2056_s10 + $0x18] sm:$0xff]  ;;  %v1887_v40 = vld [vmem:[%s2056_s10 + $0x28] sm:$0xff] }
   0x5   :  { %1532 = vmatprep.mubr.msk.f32.mxu0 %vm57_vm1, %v1760_v3  ;;  %v1848_v27 = vld [vmem:[%s2056_s10] sm:$0xff]  ;;  %1667 = vset.pattern.permute.xlu1 %v1675_v28 }
   0x6   :  { %1668 = vset.pattern.permute.xlu0 %v1675_v28  ;;  %v1878_v38 = vld [vmem:[%s2056_s10 + $0x20] sm:$0xff] }
   0x7   :  { %v673_v48 = vld [vmem:[%s2057_s2] sm:$0xff] }
   0x8   :  { %1533 = vmatmul.mubr.msk.f32.gmra.mxu0 %vm57_vm1, %v1770_v4  ;;  %v1417_v58 = vld [vmem:[%s2058_s4] ss:$0 sm:$0xff] }
   0x9   :  { %1535 = vmatprep.mubr.msk.f32.mxu0 %vm57_vm1, %v1775_v5  ;;  %v1418_v62 = vld [vmem:[%s2059_s5] ss:$0 sm:$0xff] }
   0xc   :  { %1536 = vmatmul.mubr.msk.f32.gmra.mxu0 %vm57_vm1, %v1784_v6 }
   0xd   :  { %1565 = vmatprep.mubr.msk.f32.mxu0 %vm1674_vm2, %v1673_v7 }
  0xc4   :  { %v1794_v8 = vpop.f32.mrf.mxu0 }
  0xc5   :  { %v252_v18 = vmul.f32 %v1794_v8, %v1794_v8 }
  0xc6   :  { %v1796_v9 = vpop.f32.mrf.mxu0 }
  0xc7   :  { %v251_v20 = vmul.f32 %v1796_v9, %v1796_v9 }
  0xc8   :  { %v1798_v10 = vpop.f32.mrf.mxu0 }
  0xc9   :  { %v254_v16 = vmul.f32 %v1798_v10, %v1798_v10 }
  0xca   :  { %v1800_v11 = vpop.f32.mrf.mxu0 }
  0xcb   :  { %v253_v17 = vmul.f32 %v1800_v11, %v1800_v11 }
  0xcc   :  { %v1802_v12 = vpop.f32.mrf.mxu0 }
  0xcd   :  { %v256_v13 = vmul.f32 %v1802_v12, %v1802_v12  ;;  %1539 = vmatpush3.msra.mxu1 %v1802_v12 }
  0xce   :  { %v1807_v14 = vpop.f32.mrf.mxu0  ;;  %1540 = vmatprep.subr.mxu1 %v1673_v7 }
  0xcf   :  { %v255_v15 = vmul.f32 %v1807_v14, %v1807_v14  ;;  %1541 = vmatpush3.msra.mxu1 %v1807_v14  ;;  %1554 = vmatpush3.msra.mxu0 %v256_v13 }
  0xd0   :  { %1542 = vmatprep.subr.mxu1 %v1673_v7  ;;  %1555 = vmatprep.subr.mxu0 %v1673_v7 }
  0xd1   :  { %1543 = vmatpush3.msra.mxu1 %v1798_v10  ;;  %1556 = vmatpush3.msra.mxu0 %v255_v15 }
  0xd2   :  { %1544 = vmatprep.subr.mxu1 %v1673_v7  ;;  %1557 = vmatprep.subr.mxu0 %v1673_v7 }
  0xd3   :  { %1545 = vmatpush3.msra.mxu1 %v1800_v11  ;;  %1558 = vmatpush3.msra.mxu0 %v254_v16 }
  0xd4   :  { %1546 = vmatprep.subr.mxu1 %v1673_v7  ;;  %1559 = vmatprep.subr.mxu0 %v1673_v7 }
  0xd5   :  { %1547 = vmatpush3.msra.mxu1 %v1794_v8  ;;  %1560 = vmatpush3.msra.mxu0 %v253_v17 }
  0xd6   :  { %1548 = vmatprep.subr.mxu1 %v1673_v7  ;;  %1561 = vmatprep.subr.mxu0 %v1673_v7 }
  0xd7   :  { %1549 = vmatpush3.msra.mxu1 %v1796_v9  ;;  %1562 = vmatpush3.msra.mxu0 %v252_v18 }
  0xd8   :  { %1551 = vmatmul.mubr.msk.f32.vlgmr.msra.gmra.mxu1 %vm177_vm3, %v1831_v19  ;;  %1563 = vmatprep.subr.mxu0 %v1673_v7 }
  0xd9   :  { %1564 = vmatpush3.msra.mxu0 %v251_v20  ;;  %1570 = vmatprep.mubr.msk.f32.mxu1 %vm341_vm5, %v1848_v27 }
  0xda   :  { %1566 = vmatmul.mubr.msk.f32.vlgmr.msra.gmra.mxu0 %vm177_vm3, %v1831_v19 }
  0xdb   :  { %1581 = vmatprep.mubr.msk.f32.mxu0 %vm341_vm5, %v1848_v27 }
 0x198   :  { %v247_v21 = vpop.f32.mrf.mxu1 }
 0x199   :  { %v328_v22 = vsel %vm327_vm4, %v247_v21, 0.0 }
 0x19a   :  { %v323_v23 = vpop.f32.mrf.mxu0  ;;  %329 = vadd.xlane.f32.xlu0 %v328_v22  ;;  %v1552_v24 = vpop.f32.mrf.mxu1 }
 0x19b   :  { %v333_v25 = vsel %vm327_vm4, %v323_v23, 0.0 }
 0x19c   :  { %v1567_v26 = vpop.f32.mrf.mxu0 }
 0x19e   :  { %334 = vadd.xlane.f32.xlu0 %v333_v25 }
 0x223   :  { %v330_v29 = vpop.xlane.xlu0 %329 }
 0x224   :  { %v332_v30 = vmul.f32 0.0052083335, %v330_v29 }
 0x226   :  { %1568 = vmatprep.subr.msk.mxu1 %vm360_vm6, %v332_v30  ;;  %v337_v34 = vmul.f32 %v332_v30, %v332_v30 }
 0x227   :  { %1569 = vmatpush3.msk.msra.mxu1 %vm360_vm6, %v332_v30  ;;  %v335_v33 = vpop.xlane.xlu0 %334 }
 0x228   :  { %v336_v35 = vmul.f32 0.0052083335, %v335_v33  ;;  %1571 = vmatmul.mubr.msk.f32.vlgmr.msra.gmra.mxu1 %vm341_vm5, %v1857_v31  ;;  %1590 = vmatprep.subr.mxu1 %v673_v48 }
 0x229   :  { %1573 = vmatprep.mubr.msk.f32.mxu1 %vm341_vm5, %v1863_v32  ;;  %1591 = vmatpush3.msra.mxu1 %v673_v48 }
 0x22a   :  { %v338_v37 = vsub.f32 %v336_v35, %v337_v34  ;;  %1616 = vmatprep.subr.mxu1 %v1673_v7 }
 0x22c   :  { %v339_v39 = vadd.f32 1e-08, %v338_v37  ;;  %1574 = vmatmul.mubr.msk.f32.gmra.mxu1 %vm341_vm5, %v1873_v36 }
 0x22d   :  { %1576 = vmatprep.mubr.msk.f32.mxu1 %vm341_vm5, %v1878_v38 }
 0x22e   :  { %1669 = vrsqrt.f32 %v339_v39 }
 0x230   :  { %1577 = vmatmul.mubr.msk.f32.gmra.mxu1 %vm341_vm5, %v1887_v40 }
 0x23b   :  { %v1670_v41 = vpop.eup %1669 }
 0x23c   :  { %1579 = vmatprep.subr.msk.mxu0 %vm360_vm6, %v1670_v41 }
 0x23d   :  { %1580 = vmatpush3.msk.msra.mxu0 %vm360_vm6, %v1670_v41 }
 0x23e   :  { %1582 = vmatmul.mubr.msk.f32.vlgmr.msra.gmra.mxu0 %vm341_vm5, %v1857_v31  ;;  %1601 = vmatprep.subr.mxu0 %v1673_v7 }
 0x23f   :  { %1584 = vmatprep.mubr.msk.f32.mxu0 %vm341_vm5, %v1863_v32 }
 0x242   :  { %1585 = vmatmul.mubr.msk.f32.gmra.mxu0 %vm341_vm5, %v1873_v36 }
 0x243   :  { %1587 = vmatprep.mubr.msk.f32.mxu0 %vm341_vm5, %v1878_v38 }
 0x246   :  { %1588 = vmatmul.mubr.msk.f32.gmra.mxu0 %vm341_vm5, %v1887_v40 }
 0x247   :  { %1613 = vmatprep.mubr.msk.f32.mxu0 %vm1674_vm2, %v1673_v7 }
 0x2e8   :  { %v1572_v42 = vpop.f32.mrf.mxu1 }
 0x2e9   :  { %564 = vperm.xlu1 %1667, %v1572_v42  }
 0x2ea   :  { %v430_v43 = vpop.f32.mrf.mxu1 }
 0x2ec   :  { %v1575_v44 = vpop.f32.mrf.mxu1 }
 0x2ed   :  { %559 = vperm.xlu1 %1667, %v430_v43  }
 0x2ee   :  { %v440_v47 = vpop.f32.mrf.mxu1 }
 0x2f0   :  { %v1578_v49 = vpop.f32.mrf.mxu1 }
 0x2f2   :  { %v450_v50 = vpop.f32.mrf.mxu1 }
 0x2fe   :  { %v1583_v45 = vpop.f32.mrf.mxu0 }
 0x2ff   :  { %600 = vperm.xlu1 %1667, %v1583_v45  }
 0x300   :  { %v528_v46 = vpop.f32.mrf.mxu0 }
 0x301   :  { %595 = vperm.xlu0 %1668, %v528_v46  }
 0x302   :  { %v1586_v51 = vpop.f32.mrf.mxu0 }
 0x303   :  { %569 = vperm.xlu1 %1667, %v440_v47  }
 0x304   :  { %v538_v52 = vpop.f32.mrf.mxu0 }
 0x306   :  { %v1589_v53 = vpop.f32.mrf.mxu0 }
 0x307   :  { %574 = vperm.xlu1 %1667, %v1575_v44  }
 0x308   :  { %v548_v54 = vpop.f32.mrf.mxu0 }
 0x30b   :  { %579 = vperm.xlu1 %1667, %v450_v50  }
 0x30f   :  { %584 = vperm.xlu1 %1667, %v1578_v49  }
 0x313   :  { %610 = vperm.xlu1 %1667, %v1586_v51  }
 0x317   :  { %605 = vperm.xlu1 %1667, %v538_v52  }
 0x31b   :  { %615 = vperm.xlu1 %1667, %v548_v54  }
 0x31f   :  { %620 = vperm.xlu1 %1667, %v1589_v53  }
 0x364   :  { %v565_v55 = vpop.permute.xlu1 %564 }
 0x365   :  { %v588_v57 = vsub.f32 %v1794_v8, %v565_v55  ;;  %v660_v8 = vstv %s2060_s8 }
 0x368   :  { %v560_v56 = vpop.permute.xlu1 %559 }
 0x369   :  { %v587_v60 = vsub.f32 %v1796_v9, %v560_v56 }
 0x37a   :  { %v601_v59 = vpop.permute.xlu1 %600 }
 0x37b   :  { %v624_v61 = vmul.f32 %v601_v59, %v588_v57 }
 0x37c   :  { %v596_v63 = vpop.permute.xlu0 %595 }
 0x37d   :  { %v636_v0 = vmul.f32 %v1417_v58, %v624_v61  ;;  %v623_v13 = vmul.f32 %v596_v63, %v587_v60 }
 0x37e   :  { %v570_v15 = vpop.permute.xlu1 %569 }
 0x37f   :  { %v648_v16 = vadd.f32 %v1418_v62, %v636_v0  ;;  %v635_v17 = vmul.f32 %v1417_v58, %v623_v13  ;;  %v589_v30 = vsub.f32 %v1800_v11, %v570_v15 }
 0x381   :  { %v647_v18 = vadd.f32 %v1418_v62, %v635_v17  ;;  %v662_v20 = vmul.f32 %v660_v8, %v648_v16  ;;  %vm654_vm7 = vcmp.ge.f32.partialorder %v648_v16, 0.0 }
 0x382   :  { %v575_v21 = vpop.permute.xlu1 %574 }
 0x383   :  { %vm653_vm8 = vcmp.ge.f32.partialorder %v647_v18, 0.0  ;;  %v661_v9 = vmul.f32 %v660_v8, %v647_v18  ;;  %v668_v24 = vsel %vm654_vm7, %v648_v16, %v662_v20  ;;  %v590_v26 = vsub.f32 %v1798_v10, %v575_v21 }
 0x385   :  { %v667_v22 = vsel %vm653_vm8, %v647_v18, %v661_v9 }
 0x386   :  { %1592 = vmatprep.mubr.msk.f32.mxu1 %vm674_vm9, %v667_v22  ;;  %v580_v23 = vpop.permute.xlu1 %579 }
 0x387   :  { %1593 = vmatmul.mubr.msk.f32.vlgmr.msra.gmra.mxu1 %vm674_vm9, %v668_v24  ;;  %v591_v39 = vsub.f32 %v1807_v14, %v580_v23 }
 0x38a   :  { %v585_v25 = vpop.permute.xlu1 %584 }
 0x38b   :  { %v592_v45 = vsub.f32 %v1802_v12, %v585_v25 }
 0x38e   :  { %v611_v28 = vpop.permute.xlu1 %610 }
 0x38f   :  { %v626_v29 = vmul.f32 %v611_v28, %v590_v26 }
 0x391   :  { %v638_v33 = vmul.f32 %v1417_v58, %v626_v29 }
 0x392   :  { %v606_v34 = vpop.permute.xlu1 %605 }
 0x393   :  { %v625_v35 = vmul.f32 %v606_v34, %v589_v30  ;;  %v650_v37 = vadd.f32 %v1418_v62, %v638_v33 }
 0x395   :  { %v637_v41 = vmul.f32 %v1417_v58, %v625_v35  ;;  %v664_v46 = vmul.f32 %v660_v8, %v650_v37  ;;  %vm656_vm11 = vcmp.ge.f32.partialorder %v650_v37, 0.0 }
 0x396   :  { %v616_v42 = vpop.permute.xlu1 %615 }
 0x397   :  { %v649_v43 = vadd.f32 %v1418_v62, %v637_v41  ;;  %v627_v44 = vmul.f32 %v616_v42, %v591_v39  ;;  %v670_v51 = vsel %vm656_vm11, %v650_v37, %v664_v46 }
 0x399   :  { %v639_v47 = vmul.f32 %v1417_v58, %v627_v44  ;;  %vm655_vm10 = vcmp.ge.f32.partialorder %v649_v43, 0.0  ;;  %v663_v10 = vmul.f32 %v660_v8, %v649_v43 }
 0x39a   :  { %v621_v48 = vpop.permute.xlu1 %620 }
 0x39b   :  { %v651_v49 = vadd.f32 %v1418_v62, %v639_v47  ;;  %v628_v11 = vmul.f32 %v621_v48, %v592_v45  ;;  %v669_v50 = vsel %vm655_vm10, %v649_v43, %v663_v10  ;;  %v1441_v43 = vld [vmem:[%s2062_s6] ss:$0 sm:$0xff] }
 0x39c   :  { %1595 = vmatprep.mubr.msk.f32.mxu1 %vm674_vm9, %v669_v50  ;;  %v1442_v48 = vld [vmem:[%s2063_s7] ss:$0 sm:$0xff] }
 0x39d   :  { %v640_v52 = vmul.f32 %v1417_v58, %v628_v11  ;;  %1596 = vmatmul.mubr.msk.f32.gmra.mxu1 %vm674_vm9, %v670_v51  ;;  %vm657_vm12 = vcmp.ge.f32.partialorder %v651_v49, 0.0  ;;  %v665_v14 = vmul.f32 %v660_v8, %v651_v49 }
 0x39f   :  { %v652_v53 = vadd.f32 %v1418_v62, %v640_v52  ;;  %v671_v54 = vsel %vm657_vm12, %v651_v49, %v665_v14 }
 0x3a0   :  { %1598 = vmatprep.mubr.msk.f32.mxu1 %vm674_vm9, %v671_v54 }
 0x3a1   :  { %vm658_vm13 = vcmp.ge.f32.partialorder %v652_v53, 0.0  ;;  %v666_v12 = vmul.f32 %v660_v8, %v652_v53 }
 0x3a3   :  { %v672_v55 = vsel %vm658_vm13, %v652_v53, %v666_v12 }
 0x3a4   :  { %1599 = vmatmul.mubr.msk.f32.gmra.mxu1 %vm674_vm9, %v672_v55 }
 0x3a5   :  { %1628 = vmatprep.mubr.msk.f32.mxu1 %vm1674_vm2, %v1673_v7 }
 0x447   :  { %v1933_v56 = vpop.f32.mrf.mxu1 }
 0x448   :  { %v861_v15 = vmul.f32 %v1933_v56, %v1933_v56 }
 0x449   :  { %v1935_v57 = vpop.f32.mrf.mxu1 }
 0x44a   :  { %v860_v8 = vmul.f32 %v1935_v57, %v1935_v57 }
 0x45d   :  { %v1937_v58 = vpop.f32.mrf.mxu1 }
 0x45e   :  { %v863_v0 = vmul.f32 %v1937_v58, %v1937_v58 }
 0x45f   :  { %v1939_v59 = vpop.f32.mrf.mxu1 }
 0x460   :  { %v862_v13 = vmul.f32 %v1939_v59, %v1939_v59 }
 0x464   :  { %v1941_v60 = vpop.f32.mrf.mxu1 }
 0x465   :  { %v865_v61 = vmul.f32 %v1941_v60, %v1941_v60  ;;  %1602 = vmatpush3.msra.mxu0 %v1941_v60 }
 0x466   :  { %v1946_v62 = vpop.f32.mrf.mxu1  ;;  %1603 = vmatprep.subr.mxu0 %v1673_v7 }
 0x467   :  { %v864_v63 = vmul.f32 %v1946_v62, %v1946_v62  ;;  %1604 = vmatpush3.msra.mxu0 %v1946_v62  ;;  %1617 = vmatpush3.msra.mxu1 %v865_v61 }
 0x468   :  { %1605 = vmatprep.subr.mxu0 %v1673_v7  ;;  %1618 = vmatprep.subr.mxu1 %v1673_v7 }
 0x469   :  { %1606 = vmatpush3.msra.mxu0 %v1937_v58  ;;  %1619 = vmatpush3.msra.mxu1 %v864_v63 }
 0x46a   :  { %1607 = vmatprep.subr.mxu0 %v1673_v7  ;;  %1620 = vmatprep.subr.mxu1 %v1673_v7 }
 0x46b   :  { %1608 = vmatpush3.msra.mxu0 %v1939_v59  ;;  %1621 = vmatpush3.msra.mxu1 %v863_v0 }
 0x46c   :  { %1609 = vmatprep.subr.mxu0 %v1673_v7  ;;  %1622 = vmatprep.subr.mxu1 %v1673_v7 }
 0x46d   :  { %1610 = vmatpush3.msra.mxu0 %v1933_v56  ;;  %1623 = vmatpush3.msra.mxu1 %v862_v13 }
 0x46e   :  { %1611 = vmatprep.subr.mxu0 %v1673_v7  ;;  %1624 = vmatprep.subr.mxu1 %v1673_v7 }
 0x46f   :  { %1612 = vmatpush3.msra.mxu0 %v1935_v57  ;;  %1625 = vmatpush3.msra.mxu1 %v861_v15 }
 0x470   :  { %1614 = vmatmul.mubr.msk.f32.vlgmr.msra.gmra.mxu0 %vm177_vm3, %v1831_v19  ;;  %1626 = vmatprep.subr.mxu1 %v1673_v7 }
 0x471   :  { %1627 = vmatpush3.msra.mxu1 %v860_v8  ;;  %1633 = vmatprep.mubr.msk.f32.mxu0 %vm341_vm5, %v1848_v27 }
 0x472   :  { %1629 = vmatmul.mubr.msk.f32.vlgmr.msra.gmra.mxu1 %vm177_vm3, %v1831_v19  ;;  %v1240_v19 = vld [vmem:[%s2061_s3] sm:$0xf] }
 0x473   :  { %1644 = vmatprep.mubr.msk.f32.mxu1 %vm341_vm5, %v1848_v27 }
 0x530   :  { %v856_v16 = vpop.f32.mrf.mxu0 }
 0x531   :  { %v936_v17 = vsel %vm327_vm4, %v856_v16, 0.0 }
 0x532   :  { %v932_v18 = vpop.f32.mrf.mxu1  ;;  %937 = vadd.xlane.f32.xlu1 %v936_v17  ;;  %v1615_v20 = vpop.f32.mrf.mxu0 }
 0x533   :  { %v940_v21 = vsel %vm327_vm4, %v932_v18, 0.0 }
 0x534   :  { %941 = vadd.xlane.f32.xlu0 %v940_v21  ;;  %v1630_v7 = vpop.f32.mrf.mxu1 }
 0x5bb   :  { %v938_v9 = vpop.xlane.xlu1 %937 }
 0x5bc   :  { %v939_v22 = vmul.f32 0.0052083335, %v938_v9 }
 0x5bd   :  { %v942_v23 = vpop.xlane.xlu0 %941 }
 0x5be   :  { %v943_v24 = vmul.f32 0.0052083335, %v942_v23  ;;  %v944_v25 = vmul.f32 %v939_v22, %v939_v22  ;;  %1631 = vmatprep.subr.msk.mxu0 %vm360_vm6, %v939_v22 }
 0x5bf   :  { %1632 = vmatpush3.msk.msra.mxu0 %vm360_vm6, %v939_v22 }
 0x5c0   :  { %v945_v27 = vsub.f32 %v943_v24, %v944_v25  ;;  %1634 = vmatmul.mubr.msk.f32.vlgmr.msra.gmra.mxu0 %vm341_vm5, %v1857_v31  ;;  %1653 = vmatprep.subr.msk.mxu0 %vm76_vm0, %v1240_v19 }
 0x5c1   :  { %1636 = vmatprep.mubr.msk.f32.mxu0 %vm341_vm5, %v1863_v32  ;;  %1654 = vmatpush3.msk.msra.mxu0 %vm76_vm0, %v1240_v19 }
 0x5c2   :  { %v946_v26 = vadd.f32 1e-08, %v945_v27 }
 0x5c4   :  { %1671 = vrsqrt.f32 %v946_v26  ;;  %1637 = vmatmul.mubr.msk.f32.gmra.mxu0 %vm341_vm5, %v1873_v36 }
 0x5c5   :  { %1639 = vmatprep.mubr.msk.f32.mxu0 %vm341_vm5, %v1878_v38 }
 0x5c8   :  { %1640 = vmatmul.mubr.msk.f32.gmra.mxu0 %vm341_vm5, %v1887_v40 }
 0x5c9   :  { %1655 = vmatprep.mubr.msk.f32.mxu0 %vm57_vm1, %v1747_v1 }
 0x5cc   :  { %1656 = vmatmul.mubr.msk.f32.vlgmr.msra.gmra.mxu0 %vm57_vm1, %v1752_v2 }
 0x5cd   :  { %1658 = vmatprep.mubr.msk.f32.mxu0 %vm57_vm1, %v1760_v3 }
 0x5d0   :  { %1659 = vmatmul.mubr.msk.f32.gmra.mxu0 %vm57_vm1, %v1770_v4 }
 0x5d1   :  { %v1672_v28 = vpop.eup %1671  ;;  %1661 = vmatprep.mubr.msk.f32.mxu0 %vm57_vm1, %v1775_v5 }
 0x5d2   :  { %1642 = vmatprep.subr.msk.mxu1 %vm360_vm6, %v1672_v28 }
 0x5d3   :  { %1643 = vmatpush3.msk.msra.mxu1 %vm360_vm6, %v1672_v28 }
 0x5d4   :  { %1645 = vmatmul.mubr.msk.f32.vlgmr.msra.gmra.mxu1 %vm341_vm5, %v1857_v31  ;;  %1662 = vmatmul.mubr.msk.f32.gmra.mxu0 %vm57_vm1, %v1784_v6 }
 0x5d5   :  { %1647 = vmatprep.mubr.msk.f32.mxu1 %vm341_vm5, %v1863_v32 }
 0x5d8   :  { %1648 = vmatmul.mubr.msk.f32.gmra.mxu1 %vm341_vm5, %v1873_v36 }
 0x5d9   :  { %1650 = vmatprep.mubr.msk.f32.mxu1 %vm341_vm5, %v1878_v38 }
 0x5dc   :  { %1651 = vmatmul.mubr.msk.f32.gmra.mxu1 %vm341_vm5, %v1887_v40 }
 0x680   :  { %v1635_v1 = vpop.f32.mrf.mxu0 }
 0x681   :  { %1151 = vperm.xlu0 %1668, %v1635_v1  }
 0x682   :  { %v1017_v2 = vpop.f32.mrf.mxu0 }
 0x683   :  { %1146 = vperm.xlu1 %1667, %v1017_v2  }
 0x684   :  { %v1638_v3 = vpop.f32.mrf.mxu0 }
 0x686   :  { %v1027_v4 = vpop.f32.mrf.mxu0 }
 0x687   :  { %1161 = vperm.xlu1 %1667, %v1638_v3  }
 0x688   :  { %v1641_v5 = vpop.f32.mrf.mxu0 }
 0x68a   :  { %v1037_v6 = vpop.f32.mrf.mxu0 }
 0x68b   :  { %1156 = vperm.xlu1 %1667, %v1027_v4   ;;  %1166 = vperm.xlu0 %1668, %v1037_v6  }
 0x68c   :  { %v1657_v39 = vpop.f32.mrf.mxu0 }
 0x68e   :  { %v1310_v45 = vpop.f32.mrf.mxu0 }
 0x68f   :  { %1171 = vperm.xlu1 %1667, %v1641_v5  }
 0x690   :  { %v1660_v52 = vpop.f32.mrf.mxu0 }
 0x692   :  { %v1320_v8 = vpop.f32.mrf.mxu0 }
 0x694   :  { %v1646_v31 = vpop.f32.mrf.mxu1  ;;  %v1663_v24 = vpop.f32.mrf.mxu0 }
 0x695   :  { %1187 = vperm.xlu1 %1667, %v1646_v31  }
 0x696   :  { %v1115_v32 = vpop.f32.mrf.mxu1  ;;  %v1330_v5 = vpop.f32.mrf.mxu0 }
 0x697   :  { %1182 = vperm.xlu0 %1668, %v1115_v32  }
 0x698   :  { %v1649_v36 = vpop.f32.mrf.mxu1 }
 0x699   :  { %1197 = vperm.xlu1 %1667, %v1649_v36  }
 0x69a   :  { %v1125_v38 = vpop.f32.mrf.mxu1 }
 0x69b   :  { %1192 = vperm.xlu0 %1668, %v1125_v38  }
 0x69c   :  { %v1652_v40 = vpop.f32.mrf.mxu1 }
 0x69d   :  { %1207 = vperm.xlu1 %1667, %v1652_v40  }
 0x69e   :  { %v1135_v29 = vpop.f32.mrf.mxu1 }
 0x69f   :  { %1202 = vperm.xlu0 %1668, %v1135_v29  }
 0x6fc   :  { %v1152_v35 = vpop.permute.xlu0 %1151 }
 0x6fd   :  { %v1175_v42 = vsub.f32 %v1933_v56, %v1152_v35 }
 0x6fe   :  { %v1147_v30 = vpop.permute.xlu1 %1146 }
 0x6ff   :  { %v1174_v46 = vsub.f32 %v1935_v57, %v1147_v30  ;;  %v1352_v57 = vstv %s2064_s9 }
 0x702   :  { %v1162_v33 = vpop.permute.xlu1 %1161 }
 0x703   :  { %v1177_v49 = vsub.f32 %v1937_v58, %v1162_v33 }
 0x706   :  { %v1157_v34 = vpop.permute.xlu1 %1156  ;;  %v1167_v41 = vpop.permute.xlu0 %1166 }
 0x707   :  { %v1176_v14 = vsub.f32 %v1939_v59, %v1157_v34  ;;  %v1178_v13 = vsub.f32 %v1946_v62, %v1167_v41 }
 0x70a   :  { %v1172_v37 = vpop.permute.xlu1 %1171 }
 0x70b   :  { %v1179_v55 = vsub.f32 %v1941_v60, %v1172_v37 }
 0x710   :  { %v1188_v44 = vpop.permute.xlu1 %1187 }
 0x711   :  { %v1211_v47 = vmul.f32 %v1188_v44, %v1175_v42 }
 0x712   :  { %v1183_v10 = vpop.permute.xlu0 %1182 }
 0x713   :  { %v1223_v11 = vmul.f32 %v1441_v43, %v1211_v47  ;;  %v1210_v50 = vmul.f32 %v1183_v10, %v1174_v46 }
 0x714   :  { %v1198_v51 = vpop.permute.xlu1 %1197 }
 0x715   :  { %v1222_v53 = vmul.f32 %v1441_v43, %v1210_v50  ;;  %v1213_v54 = vmul.f32 %v1198_v51, %v1177_v49  ;;  %v1235_v12 = vadd.f32 %v1442_v48, %v1223_v11 }
 0x716   :  { %v1193_v56 = vpop.permute.xlu0 %1192 }
 0x717   :  { %v1225_v61 = vmul.f32 %v1441_v43, %v1213_v54  ;;  %v1212_v63 = vmul.f32 %v1193_v56, %v1176_v14  ;;  %v1340_v0 = vadd.f32 %v1657_v39, %v1235_v12  ;;  %v1234_v58 = vadd.f32 %v1442_v48, %v1222_v53 }
 0x718   :  { %v1208_v15 = vpop.permute.xlu1 %1207 }
 0x719   :  { %v1224_v16 = vmul.f32 %v1441_v43, %v1212_v63  ;;  %vm1346_vm14 = vcmp.ge.f32.partialorder %v1340_v0, 0.0  ;;  %v1354_v59 = vmul.f32 %v1352_v57, %v1340_v0  ;;  %v1215_v17 = vmul.f32 %v1208_v15, %v1179_v55 }
 0x71a   :  { %v1339_v18 = vadd.f32 %v1310_v45, %v1234_v58  ;;  %v1203_v20 = vpop.permute.xlu0 %1202  ;;  %v1237_v60 = vadd.f32 %v1442_v48, %v1225_v61 }
 0x71b   :  { %v1360_v21 = vsel %vm1346_vm14, %v1340_v0, %v1354_v59  ;;  %v1227_v7 = vmul.f32 %v1441_v43, %v1215_v17  ;;  %v1214_v9 = vmul.f32 %v1203_v20, %v1178_v13  ;;  %v1236_v22 = vadd.f32 %v1442_v48, %v1224_v16 }
 0x71c   :  { %1366 = vst.msk [vmem:[#allocation2 + $0x8] sm:$0xff] %vm674_vm9, %v1360_v21  ;;  %vm1345_vm15 = vcmp.ge.f32.partialorder %v1339_v18, 0.0  ;;  %v1353_v23 = vmul.f32 %v1352_v57, %v1339_v18  ;;  %v1342_v19 = vadd.f32 %v1660_v52, %v1237_v60 }
 0x71d   :  { %v1226_v62 = vmul.f32 %v1441_v43, %v1214_v9  ;;  %v1341_v25 = vadd.f32 %v1320_v8, %v1236_v22  ;;  %v1239_v27 = vadd.f32 %v1442_v48, %v1227_v7 }
 0x71e   :  { %v1359_v26 = vsel %vm1345_vm15, %v1339_v18, %v1353_v23  ;;  %vm1348_vm0 = vcmp.ge.f32.partialorder %v1342_v19, 0.0  ;;  %v1356_v28 = vmul.f32 %v1352_v57, %v1342_v19 }
 0x71f   :  { %1365 = vst.msk [vmem:[#allocation2] sm:$0xff] %vm674_vm9, %v1359_v26  ;;  %vm1347_vm1 = vcmp.ge.f32.partialorder %v1341_v25, 0.0  ;;  %v1355_v1 = vmul.f32 %v1352_v57, %v1341_v25  ;;  %v1344_v2 = vadd.f32 %v1663_v24, %v1239_v27  ;;  %v1238_v3 = vadd.f32 %v1442_v48, %v1226_v62 }
 0x720   :  { %v1362_v4 = vsel %vm1348_vm0, %v1342_v19, %v1356_v28 }
 0x721   :  { %1368 = vst.msk [vmem:[#allocation2 + $0x18] sm:$0xff] %vm674_vm9, %v1362_v4  ;;  %v1361_v6 = vsel %vm1347_vm1, %v1341_v25, %v1355_v1  ;;  %vm1350_vm2 = vcmp.ge.f32.partialorder %v1344_v2, 0.0  ;;  %v1358_v31 = vmul.f32 %v1352_v57, %v1344_v2  ;;  %v1343_v32 = vadd.f32 %v1330_v5, %v1238_v3 }
 0x722   :  { %1367 = vst.msk [vmem:[#allocation2 + $0x10] sm:$0xff] %vm674_vm9, %v1361_v6 }
 0x723   :  { %v1364_v36 = vsel %vm1350_vm2, %v1344_v2, %v1358_v31  ;;  %vm1349_vm3 = vcmp.ge.f32.partialorder %v1343_v32, 0.0  ;;  %v1357_v38 = vmul.f32 %v1352_v57, %v1343_v32 }
 0x724   :  { %1370 = vst.msk [vmem:[#allocation2 + $0x28] sm:$0xff] %vm674_vm9, %v1364_v36 }
 0x725   :  { %v1363_v40 = vsel %vm1349_vm3, %v1343_v32, %v1357_v38 }
 0x726   :  { %1369 = vst.msk [vmem:[#allocation2 + $0x20] sm:$0xff] %vm674_vm9, %v1363_v40 }
 0x729   :  { %v1371_v29 = vld [vmem:[#allocation2] ss:$3 sm:$0xff]  ;;  %v1375_v30 = vld [vmem:[#allocation2 + $0x1] ss:$3 sm:$0xff]  ;;  %v1381_v34 = vld [vmem:[#allocation2 + $0x2] ss:$3 sm:$0xff] }
 0x72a   :  { %v1378_v33 = vadd.f32 %v1375_v30, %v1371_v29 }
 0x72c   :  { %v1384_v35 = vadd.f32 %v1381_v34, %v1378_v33 }
 0x72d   :  { %v1373_v37 = vld [vmem:[#allocation2 + $0x18] ss:$3 sm:$0xff]  ;;  %v1377_v39 = vld [vmem:[#allocation2 + $0x19] ss:$3 sm:$0xff]  ;;  %v1383_v43 = vld [vmem:[#allocation2 + $0x1a] ss:$3 sm:$0xff] }
 0x72e   :  { %v1386_v41 = vmul.f32 0.33333334, %v1384_v35  ;;  %v1379_v42 = vadd.f32 %v1377_v39, %v1373_v37 }
 0x730   :  { %1388 = vst.msk [vmem:[%s2065_s12] sm:$0xff] %vm674_vm9, %v1386_v41  ;;  %v1385_v44 = vadd.f32 %v1383_v43, %v1379_v42 }
 0x732   :  { %v1387_v45 = vmul.f32 0.33333334, %v1385_v44 }
 0x734   :  { %1389 = vst.msk [vmem:[%s2065_s12 + $0x8] sm:$0xff] %vm674_vm9, %v1387_v45 }

</bundles_post_ra>
